<compile_context>
chip_gen: v6e
topology: v6e:2x2x1
jax: 0.10.0
libtpu: 0.0.40
codegen_flags: <defaults>
</compile_context>

<pallas_src>
import functools

import jax
import jax.numpy as jnp
from jax import lax
from jax.experimental import pallas as pl
from jax.experimental.pallas import tpu as pltpu

INPUT_SIZE = 4
HIDDEN_SIZE = 20
OUTPUT_SIZE = 3

LANE = 128            # lane-axis quantum
DEFAULT_CHUNK = 512   # inner vectorization width (lanes); keeps vreg pressure low


def _round_up(n, m):
    return ((n + m - 1) // m) * m


def _cdiv(a, b):
    return (a + b - 1) // b


def _ann_one_hid_kernel(xT_ref, w1t_ref, b1_ref, w2_ref, b2_ref, outT_ref, *, chunk):
    """xT_ref: (4, TB), w1t_ref: (20, 4), b1_ref: (20, 1), w2_ref: (20, 3),
    b2_ref: (3, 1), outT_ref: (3, TB).  Batch on lanes; TB % chunk == 0."""
    tb = xT_ref.shape[1]
    num_chunks = tb // chunk

    w1t = w1t_ref[...]                                          # (20, 4)
    w2 = w2_ref[...]                                            # (20, 3)
    b2 = b2_ref[...]                                            # (3, 1)
    # Hidden-bias lane-broadcast hoisted out of the chunk loop (JAX does not CSE broadcasts).
    b1b = jnp.broadcast_to(b1_ref[...], (HIDDEN_SIZE, chunk))   # (20, chunk)

    def body(c, carry):
        off = pl.multiple_of(c * chunk, chunk)
        xT = xT_ref[:, pl.ds(off, chunk)]                       # (4, chunk)

        # ---- Layer 1: h = ReLU(w1^T x + b1); K=4 -> short VPU broadcast-FMA chain ----
        h = b1b
        for k in range(INPUT_SIZE):
            h = h + w1t[:, k:k + 1] * xT[k:k + 1, :]            # (20,1)*(1,chunk) -> (20,chunk)
        h = jnp.maximum(h, 0.0)                                 # (20, chunk)

        # ---- Layer 2: y_j = sum_k w2[k, j] * h[k, :] + b2[j] ----
        # Full-width multiplies + sublane (XLU) reductions: ~3x fewer VALU vreg-ops than the
        # 20-step broadcast-FMA chain and removes the 20-long dependent add chain.
        rows = [
            jnp.sum(h * w2[:, j:j + 1], axis=0, keepdims=True)  # (1, chunk)
            for j in range(OUTPUT_SIZE)
        ]
        y = jnp.concatenate(rows, axis=0) + b2                  # (3, chunk)
        outT_ref[:, pl.ds(off, chunk)] = y.astype(outT_ref.dtype)
        return carry

    lax.fori_loop(0, num_chunks, body, 0)


def ann_one_hid_forward_t(xT, w1, b1, w2, b2, *, block_b=8192, min_grid=2,
                          chunk=DEFAULT_CHUNK):
    """Feature-major entry: xT (4, B) -> yT (3, B).  Avoids wrapper-side transposes."""
    B = xT.shape[1]
    b_min = _round_up(B, LANE)

    # Batch tile: multiple of LANE, capped by block_b and the (padded) batch size.
    tb = min(_round_up(block_b, LANE), b_min)
    # v7x megacore: keep at least `min_grid` grid steps when the batch allows it, so the
    # "parallel" axis can be sharded across both TensorCores (harmless on v5e/v6e).
    if b_min >= min_grid * LANE:
        tb = min(tb, _round_up(_cdiv(b_min, min_grid), LANE))

    B_pad = _round_up(B, tb)
    grid_b = B_pad // tb

    # Inner vectorization width: largest lane-aligned divisor of tb not exceeding `chunk`.
    chunk = next(c for c in (chunk, 1024, 512, 256, 128)
                 if c % LANE == 0 and c <= tb and tb % c == 0)

    xT = xT.astype(jnp.float32)
    if B_pad != B:
        xT = jnp.pad(xT, ((0, 0), (0, B_pad - B)))   # zero pad; padded lanes sliced off below

    w1t = w1.T.astype(jnp.float32)                   # (20, 4): columns = rows of w1
    b1c = b1.reshape(HIDDEN_SIZE, 1).astype(jnp.float32)
    w2c = w2.astype(jnp.float32)                     # (20, 3): columns used directly
    b2c = b2.reshape(OUTPUT_SIZE, 1).astype(jnp.float32)

    yT = pl.pallas_call(
        functools.partial(_ann_one_hid_kernel, chunk=chunk),
        out_shape=jax.ShapeDtypeStruct((OUTPUT_SIZE, B_pad), jnp.float32),
        grid=(grid_b,),
        in_specs=[
            # Only x / out move with the grid; weights & biases use constant index_maps so
            # their single tiny DMA is reused across all grid steps.
            pl.BlockSpec((INPUT_SIZE, tb), lambda i: (0, i)),
            pl.BlockSpec((HIDDEN_SIZE, INPUT_SIZE), lambda i: (0, 0)),
            pl.BlockSpec((HIDDEN_SIZE, 1), lambda i: (0, 0)),
            pl.BlockSpec((HIDDEN_SIZE, OUTPUT_SIZE), lambda i: (0, 0)),
            pl.BlockSpec((OUTPUT_SIZE, 1), lambda i: (0, 0)),
        ],
        out_specs=pl.BlockSpec((OUTPUT_SIZE, tb), lambda i: (0, i)),
        compiler_params=pltpu.CompilerParams(
            dimension_semantics=("parallel",),    # megacore sharding on v7x; no-op on v5e/v6e
            vmem_limit_bytes=32 * 1024 * 1024,    # ~2 MiB footprint at tb=8192; safe everywhere
        ),
    )(xT, w1t, b1c, w2c, b2c)

    return yT if B_pad == B else yT[:, :B]


def ann_one_hid_forward(x, w1, b1, w2, b2, **kwargs):
    """PyTorch-layout entry: x (B, 4) -> (B, 3).  Thin transpose shim around the
    feature-major kernel; callers that can provide (4, B) / consume (3, B) should use
    ann_one_hid_forward_t directly to avoid the two extra HBM passes."""
    return ann_one_hid_forward_t(x.T, w1, b1, w2, b2, **kwargs).T


if __name__ == "__main__":
    key = jax.random.PRNGKey(0)
    kx, kw1, kb1, kw2, kb2, kx2, kx3 = jax.random.split(key, 7)

    # Deterministic "parameter init" mimicking nn.Linear's uniform(-1/sqrt(fan_in), ...).
    bound1 = 1.0 / (INPUT_SIZE ** 0.5)
    bound2 = 1.0 / (HIDDEN_SIZE ** 0.5)
    w1 = jax.random.uniform(kw1, (INPUT_SIZE, HIDDEN_SIZE), jnp.float32, -bound1, bound1)
    b1 = jax.random.uniform(kb1, (HIDDEN_SIZE,), jnp.float32, -bound1, bound1)
    w2 = jax.random.uniform(kw2, (HIDDEN_SIZE, OUTPUT_SIZE), jnp.float32, -bound2, bound2)
    b2 = jax.random.uniform(kb2, (OUTPUT_SIZE,), jnp.float32, -bound2, bound2)

    def ref_fwd(x):
        h = jnp.maximum(x @ w1 + b1, 0.0)
        return h @ w2 + b2

    # Case 1: tiny batch (single 128-lane tile, single grid step, single chunk).
    x = jax.random.normal(kx, (8, INPUT_SIZE), dtype=jnp.float32)
    out = jax.block_until_ready(ann_one_hid_forward(x, w1, b1, w2, b2))
    assert out.shape == (8, OUTPUT_SIZE), out.shape
    assert jnp.allclose(out, ref_fwd(x), atol=1e-5, rtol=1e-5), "mismatch vs reference (batch=8)"

    # Case 2: non-multiple batch -> zero-padded lanes + 2-step 'parallel' grid.
    x2 = jax.random.normal(kx2, (300, INPUT_SIZE), dtype=jnp.float32)
    out2 = jax.block_until_ready(ann_one_hid_forward(x2, w1, b1, w2, b2))
    assert out2.shape == (300, OUTPUT_SIZE), out2.shape
    assert jnp.allclose(out2, ref_fwd(x2), atol=1e-5, rtol=1e-5), "mismatch vs reference (batch=300)"

    # Case 3: exercises the inner chunk loop (tb=2048, chunk=512, 4 chunks per step) and a
    # 2-step grid, via the transpose-free feature-major entry point.
    x3 = jax.random.normal(kx3, (4096, INPUT_SIZE), dtype=jnp.float32)
    out3T = jax.block_until_ready(
        ann_one_hid_forward_t(x3.T, w1, b1, w2, b2, block_b=2048))
    assert out3T.shape == (OUTPUT_SIZE, 4096), out3T.shape
    assert jnp.allclose(out3T.T, ref_fwd(x3), atol=1e-5, rtol=1e-5), "mismatch vs reference (batch=4096)"

    print("KERNEL_OK")
</pallas_src>

<mosaic_0001>
module attributes {stable_mosaic.version = 11 : i64} {
  func.func @_ann_one_hid_kernel(%arg0: i32, %arg1: memref<4x128xf32, #tpu.memory_space<vmem>>, %arg2: memref<20x4xf32, #tpu.memory_space<vmem>>, %arg3: memref<20x1xf32, #tpu.memory_space<vmem>>, %arg4: memref<20x3xf32, #tpu.memory_space<vmem>>, %arg5: memref<3x1xf32, #tpu.memory_space<vmem>>, %arg6: memref<3x128xf32, #tpu.memory_space<vmem>>) attributes {dimension_semantics = [#tpu.dimension_semantics<parallel>], iteration_bounds = array<i64: 1>, scalar_prefetch = 0 : i64, scratch_operands = 0 : i64, tpu.core_type = #tpu.core_type<tc>, window_params = [{transform_indices = @transform_0, window_bounds = array<i64: 4, 128>}, {pipeline_mode = #tpu.pipeline_mode<synchronous>, transform_indices = @transform_1, window_bounds = array<i64: 20, 4>}, {pipeline_mode = #tpu.pipeline_mode<synchronous>, transform_indices = @transform_2, window_bounds = array<i64: 20, 1>}, {pipeline_mode = #tpu.pipeline_mode<synchronous>, transform_indices = @transform_3, window_bounds = array<i64: 20, 3>}, {pipeline_mode = #tpu.pipeline_mode<synchronous>, transform_indices = @transform_4, window_bounds = array<i64: 3, 1>}, {transform_indices = @transform_5, window_bounds = array<i64: 3, 128>}]} {
    %c0 = arith.constant 0 : index
    %c0_0 = arith.constant 0 : index
    %0 = vector.load %arg2[%c0, %c0_0] : memref<20x4xf32, #tpu.memory_space<vmem>>, vector<20x4xf32>
    %c0_1 = arith.constant 0 : index
    %c0_2 = arith.constant 0 : index
    %1 = vector.load %arg4[%c0_1, %c0_2] : memref<20x3xf32, #tpu.memory_space<vmem>>, vector<20x3xf32>
    %c0_3 = arith.constant 0 : index
    %c0_4 = arith.constant 0 : index
    %2 = vector.load %arg5[%c0_3, %c0_4] : memref<3x1xf32, #tpu.memory_space<vmem>>, vector<3x1xf32>
    %c0_5 = arith.constant 0 : index
    %c0_6 = arith.constant 0 : index
    %3 = vector.load %arg3[%c0_5, %c0_6] : memref<20x1xf32, #tpu.memory_space<vmem>>, vector<20x1xf32>
    %4 = vector.shape_cast %3 : vector<20x1xf32> to vector<20x1xf32>
    %5 = vector.broadcast %4 : vector<20x1xf32> to vector<20x128xf32>
    %c0_i32 = arith.constant 0 : i32
    %c128_i32 = arith.constant 128 : i32
    %6 = arith.muli %c0_i32, %c128_i32 : i32
    %7 = tpu.assume_multiple %6, 128 : i32
    %c0_7 = arith.constant 0 : index
    %8 = arith.index_cast %7 : i32 to index
    %9 = vector.load %arg1[%c0_7, %8] : memref<4x128xf32, #tpu.memory_space<vmem>>, vector<4x128xf32>
    %10 = vector.extract_strided_slice %0 {offsets = [0, 0], sizes = [20, 1], strides = [1, 1]} : vector<20x4xf32> to vector<20x1xf32>
    %11 = vector.extract_strided_slice %9 {offsets = [0, 0], sizes = [1, 128], strides = [1, 1]} : vector<4x128xf32> to vector<1x128xf32>
    %12 = vector.broadcast %10 : vector<20x1xf32> to vector<20x128xf32>
    %13 = vector.broadcast %11 : vector<1x128xf32> to vector<20x128xf32>
    %14 = arith.mulf %12, %13 : vector<20x128xf32>
    %15 = arith.addf %5, %14 : vector<20x128xf32>
    %16 = vector.extract_strided_slice %0 {offsets = [0, 1], sizes = [20, 1], strides = [1, 1]} : vector<20x4xf32> to vector<20x1xf32>
    %17 = vector.extract_strided_slice %9 {offsets = [1, 0], sizes = [1, 128], strides = [1, 1]} : vector<4x128xf32> to vector<1x128xf32>
    %18 = vector.broadcast %16 : vector<20x1xf32> to vector<20x128xf32>
    %19 = vector.broadcast %17 : vector<1x128xf32> to vector<20x128xf32>
    %20 = arith.mulf %18, %19 : vector<20x128xf32>
    %21 = arith.addf %15, %20 : vector<20x128xf32>
    %22 = vector.extract_strided_slice %0 {offsets = [0, 2], sizes = [20, 1], strides = [1, 1]} : vector<20x4xf32> to vector<20x1xf32>
    %23 = vector.extract_strided_slice %9 {offsets = [2, 0], sizes = [1, 128], strides = [1, 1]} : vector<4x128xf32> to vector<1x128xf32>
    %24 = vector.broadcast %22 : vector<20x1xf32> to vector<20x128xf32>
    %25 = vector.broadcast %23 : vector<1x128xf32> to vector<20x128xf32>
    %26 = arith.mulf %24, %25 : vector<20x128xf32>
    %27 = arith.addf %21, %26 : vector<20x128xf32>
    %28 = vector.extract_strided_slice %0 {offsets = [0, 3], sizes = [20, 1], strides = [1, 1]} : vector<20x4xf32> to vector<20x1xf32>
    %29 = vector.extract_strided_slice %9 {offsets = [3, 0], sizes = [1, 128], strides = [1, 1]} : vector<4x128xf32> to vector<1x128xf32>
    %30 = vector.broadcast %28 : vector<20x1xf32> to vector<20x128xf32>
    %31 = vector.broadcast %29 : vector<1x128xf32> to vector<20x128xf32>
    %32 = arith.mulf %30, %31 : vector<20x128xf32>
    %33 = arith.addf %27, %32 : vector<20x128xf32>
    %cst = arith.constant 0.000000e+00 : f32
    %34 = vector.broadcast %cst : f32 to vector<20x128xf32>
    %35 = arith.maximumf %33, %34 : vector<20x128xf32>
    %36 = vector.extract_strided_slice %1 {offsets = [0, 0], sizes = [20, 1], strides = [1, 1]} : vector<20x3xf32> to vector<20x1xf32>
    %37 = vector.broadcast %36 : vector<20x1xf32> to vector<20x128xf32>
    %38 = arith.mulf %35, %37 : vector<20x128xf32>
    %cst_8 = arith.constant dense<0.000000e+00> : vector<128xf32>
    %39 = vector.multi_reduction <add>, %38, %cst_8 [0] : vector<20x128xf32> to vector<128xf32>
    %40 = vector.shape_cast %39 : vector<128xf32> to vector<1x128xf32>
    %41 = vector.extract_strided_slice %1 {offsets = [0, 1], sizes = [20, 1], strides = [1, 1]} : vector<20x3xf32> to vector<20x1xf32>
    %42 = vector.broadcast %41 : vector<20x1xf32> to vector<20x128xf32>
    %43 = arith.mulf %35, %42 : vector<20x128xf32>
    %cst_9 = arith.constant dense<0.000000e+00> : vector<128xf32>
    %44 = vector.multi_reduction <add>, %43, %cst_9 [0] : vector<20x128xf32> to vector<128xf32>
    %45 = vector.shape_cast %44 : vector<128xf32> to vector<1x128xf32>
    %46 = vector.extract_strided_slice %1 {offsets = [0, 2], sizes = [20, 1], strides = [1, 1]} : vector<20x3xf32> to vector<20x1xf32>
    %47 = vector.broadcast %46 : vector<20x1xf32> to vector<20x128xf32>
    %48 = arith.mulf %35, %47 : vector<20x128xf32>
    %cst_10 = arith.constant dense<0.000000e+00> : vector<128xf32>
    %49 = vector.multi_reduction <add>, %48, %cst_10 [0] : vector<20x128xf32> to vector<128xf32>
    %50 = vector.shape_cast %49 : vector<128xf32> to vector<1x128xf32>
    %51 = tpu.concatenate %40, %45, %50 in 0 : vector<1x128xf32>, vector<1x128xf32>, vector<1x128xf32> -> vector<3x128xf32>
    %52 = vector.broadcast %2 : vector<3x1xf32> to vector<3x128xf32>
    %53 = arith.addf %51, %52 : vector<3x128xf32>
    %c0_11 = arith.constant 0 : index
    %54 = arith.index_cast %7 : i32 to index
    %55 = vector.load %arg6[%c0_11, %54] : memref<3x128xf32, #tpu.memory_space<vmem>>, vector<3x128xf32>
    tpu.vector_store %arg6[%c0_11, %54], %53 {strides = array<i32>} : memref<3x128xf32, #tpu.memory_space<vmem>>, vector<3x128xf32>,
    %c1_i32 = arith.constant 1 : i32
    return
  }
  func.func @transform_0(%arg0: i32) -> (i32, i32) {
    %c0_i32 = arith.constant 0 : i32
    %c0_i32_0 = arith.constant 0 : i32
    return %c0_i32, %arg0 : i32, i32
  }
  func.func @transform_1(%arg0: i32) -> (i32, i32) {
    %c0_i32 = arith.constant 0 : i32
    %c0_i32_0 = arith.constant 0 : i32
    %c0_i32_1 = arith.constant 0 : i32
    return %c0_i32, %c0_i32_0 : i32, i32
  }
  func.func @transform_2(%arg0: i32) -> (i32, i32) {
    %c0_i32 = arith.constant 0 : i32
    %c0_i32_0 = arith.constant 0 : i32
    %c0_i32_1 = arith.constant 0 : i32
    return %c0_i32, %c0_i32_0 : i32, i32
  }
  func.func @transform_3(%arg0: i32) -> (i32, i32) {
    %c0_i32 = arith.constant 0 : i32
    %c0_i32_0 = arith.constant 0 : i32
    %c0_i32_1 = arith.constant 0 : i32
    return %c0_i32, %c0_i32_0 : i32, i32
  }
  func.func @transform_4(%arg0: i32) -> (i32, i32) {
    %c0_i32 = arith.constant 0 : i32
    %c0_i32_0 = arith.constant 0 : i32
    %c0_i32_1 = arith.constant 0 : i32
    return %c0_i32, %c0_i32_0 : i32, i32
  }
  func.func @transform_5(%arg0: i32) -> (i32, i32) {
    %c0_i32 = arith.constant 0 : i32
    %c0_i32_0 = arith.constant 0 : i32
    return %c0_i32, %arg0 : i32, i32
  }
}

</mosaic_0001>

<bundles_post_ra>
// kernel: tpu_custom_call.1
= control target key start
LH: loop header
LB: loop body
LE: loop exit
PB: predicated region body
PF: predicated region fallthrough
CT: control target
= control target key end

     0   :  { %v286_v2 = vmov 2   ;;  %v287_v3 = vmov 0   ;;  %s360_s0 = inlined_call_operand.vmem [shape: f32[4,128], index: 0, kind: input, shape index: {}]   ;;  %s361_s1 = inlined_call_operand.vmem [shape: f32[20,4], index: 1, kind: input, shape index: {}]   ;;  %s362_s2 = inlined_call_operand.vmem [shape: f32[20,1], index: 2, kind: input, shape index: {}]   ;;  %s363_s3 = inlined_call_operand.vmem [shape: f32[20,3], index: 3, kind: input, shape index: {}]   ;;  %s364_s4 = inlined_call_operand.vmem [shape: f32[3,1], index: 4, kind: input, shape index: {}]   ;;  %s365_s5 = inlined_call_operand.hbm [shape: f32[3,128], index: 5, kind: output, shape index: {}]  }
   0x1   :  { %v23_v0 = vld [vmem:[%s361_s1 + $0x10] sm:$0xf]  ;;  %v21_v1 = vld [vmem:[%s361_s1] sm:$0xff]  ;;  %251 = vset.pattern.permute.xlu0 %v286_v2  ;;  %247 = vset.pattern.permute.xlu1 %v287_v3 }
   0x2   :  { %59 = vperm.xlu1 %247, %v23_v0   ;;  %95 = vperm.xlu0 %251, %v21_v1   ;;  %v28_v4 = vld [vmem:[%s362_s2] sm:$0xff] }
   0x3   :  { %10 = vsyncpa [#allocation3], 0  ;;  %v288_v5 = vmov 3   ;;  %v289_v6 = vmov 1   ;;  %v22_v7 = vld [vmem:[%s361_s1 + $0x8] sm:$0xff]  ;;  %v24_v10 = vld [vmem:[%s363_s3] sm:$0xff]  ;;  %v62_v22 = vlaneseq }
   0x4   :  { %v30_v8 = vld [vmem:[%s362_s2 + $0x10] sm:$0xf]  ;;  %v29_v9 = vld [vmem:[%s362_s2 + $0x8] sm:$0xff]  ;;  %v27_v12 = vld [vmem:[%s364_s4] sm:$0x7]  ;;  %vm160_vm0 = vcmask 1043456  }
   0x5   :  { %v25_v11 = vld [vmem:[%s363_s3 + $0x8] sm:$0xff]  ;;  %v26_v13 = vld [vmem:[%s363_s3 + $0x10] sm:$0xf]  ;;  %v63_v23 = vshrl.u32 %v62_v22, 7  ;;  %v46_v27 = vld [vmem:[%s360_s0] sm:$0xf] }
   0x6   :  { %33 = vperm.xlu1 %247, %v28_v4   ;;  %253 = vset.pattern.permute.xlu0 %v288_v5  ;;  %vm217_vm1 = vcmask 1040384   ;;  %vm219_vm2 = vcmask 1041408   ;;  %s290_s0 = smov [#allocation2]  }
   0x7   :  { %117 = vperm.xlu0 %253, %v21_v1   ;;  %v64_v26 = vsub.s32 0, %v63_v23  ;;  %v86_v31 = vsub.s32 1, %v63_v23  ;;  %v108_v33 = vsub.s32 2, %v63_v23  ;;  %v130_v37 = vsub.s32 3, %v63_v23  ;;  %s234_s11 = sshll.u32 %s290_s0, 4  ;;  %s235_s11 = int_to_ptr.vmem [resolvable:$true] %s234_s11 }
   0x8   :  { %s264_s12 = scalar_lea.vmem %s235_s11, 64  ;;  %p269_p1 = scmp.lt.s32.totalorder %s235_s11, %s235_s11 }
   0x9   :  { %v65_v30 = vrot.slane %v46_v27, %v64_v26  ;;  %v87_v35 = vrot.slane %v46_v27, %v86_v31  ;;  %v109_v39 = vrot.slane %v46_v27, %v108_v33  ;;  %v131_v45 = vrot.slane %v46_v27, %v130_v37  ;;  %p265_p0 = scmp.ne.s32.totalorder %s235_s11, %s264_s12  ;;  %p270_p2 = scmp.lt.s32.totalorder %s264_s12, %s264_s12 }
   0xa   :  { %248 = vset.pattern.permute.xlu1 %v289_v6 }
   0xb   :  { %254 = vset.pattern.permute.xlu0 %v287_v3  ;;  %73 = vperm.xlu1 %248, %v21_v1   ;;  %p271_p3 = por %p270_p2, %p269_p1 }
   0xc   :  { %49 = vperm.xlu0 %254, %v21_v1  }
   0xd   :  { %p272_p4 = pnand %p271_p3, %p265_p0 }
   0xf   :  { %249 = vset.pattern.permute.xlu1 %v287_v3 }
  0x10   :  { %54 = vperm.xlu0 %254, %v22_v7   ;;  %43 = vperm.xlu1 %249, %v30_v8  }
  0x14   :  { %38 = vperm.xlu0 %254, %v29_v9   ;;  %250 = vset.pattern.permute.xlu1 %v289_v6 }
  0x15   :  { %81 = vperm.xlu1 %250, %v23_v0  }
  0x18   :  { %143 = vperm.xlu0 %254, %v24_v10  }
  0x19   :  { %252 = vset.pattern.permute.xlu1 %v286_v2 }
  0x1a   :  { %99 = vperm.xlu1 %252, %v22_v7  }
  0x1c   :  { %256 = vset.pattern.permute.xlu0 %v289_v6 }
  0x1d   :  { %77 = vperm.xlu0 %256, %v22_v7  }
  0x1e   :  { %103 = vperm.xlu1 %252, %v23_v0  }
  0x21   :  { %174 = vperm.xlu0 %256, %v25_v11  }
  0x22   :  { %255 = vset.pattern.permute.xlu1 %v288_v5 }
  0x23   :  { %121 = vperm.xlu1 %255, %v22_v7  }
  0x25   :  { %261 = vset.pattern.permute.xlu0 %v286_v2 }
  0x26   :  { %194 = vperm.xlu0 %261, %v24_v10  }
  0x27   :  { %125 = vperm.xlu1 %255, %v23_v0  }
  0x2a   :  { %263 = vset.pattern.permute.xlu0 %v287_v3 }
  0x2b   :  { %257 = vset.pattern.permute.xlu1 %v287_v3  ;;  %223 = vperm.xlu0 %263, %v27_v12  }
  0x2c   :  { %148 = vperm.xlu1 %257, %v25_v11  }
  0x30   :  { %258 = vset.pattern.permute.xlu1 %v289_v6 }
  0x31   :  { %170 = vperm.xlu1 %258, %v24_v10  }
  0x35   :  { %259 = vset.pattern.permute.xlu1 %v287_v3 }
  0x36   :  { %153 = vperm.xlu1 %259, %v26_v13  }
  0x3a   :  { %260 = vset.pattern.permute.xlu1 %v289_v6 }
  0x3b   :  { %178 = vperm.xlu1 %260, %v26_v13  }
  0x3f   :  { %262 = vset.pattern.permute.xlu1 %v286_v2 }
  0x40   :  { %198 = vperm.xlu1 %262, %v25_v11  }
  0x44   :  { %202 = vperm.xlu1 %262, %v26_v13  }
  0x7d   :  { %v60_v14 = vpop.permute.xlu1 %59  ;;  %v96_v15 = vpop.permute.xlu0 %95 }
  0x7e   :  { %v110_v46 = vmul.f32 %v109_v39, %v96_v15  ;;  %v68_v49 = vmul.f32 %v65_v30, %v60_v14 }
  0x81   :  { %v34_v16 = vpop.permute.xlu1 %33 }
  0x82   :  { %v118_v17 = vpop.permute.xlu0 %117 }
  0x83   :  { %v132_v52 = vmul.f32 %v131_v45, %v118_v17 }
  0x86   :  { %v74_v18 = vpop.permute.xlu1 %73 }
  0x87   :  { %v50_v19 = vpop.permute.xlu0 %49  ;;  %v88_v42 = vmul.f32 %v87_v35, %v74_v18 }
  0x88   :  { %v66_v34 = vmul.f32 %v65_v30, %v50_v19 }
  0x8a   :  { %v69_v40 = vadd.f32 %v66_v34, %v34_v16 }
  0x8b   :  { %v55_v20 = vpop.permute.xlu0 %54  ;;  %v44_v21 = vpop.permute.xlu1 %43 }
  0x8c   :  { %v67_v36 = vmul.f32 %v65_v30, %v55_v20  ;;  %v91_v47 = vadd.f32 %v88_v42, %v69_v40  ;;  %v71_v53 = vadd.f32 %v68_v49, %v44_v21 }
  0x8e   :  { %v113_v54 = vadd.f32 %v110_v46, %v91_v47 }
  0x8f   :  { %v39_v25 = vpop.permute.xlu0 %38 }
  0x90   :  { %v82_v24 = vpop.permute.xlu1 %81  ;;  %v70_v43 = vadd.f32 %v67_v36, %v39_v25  ;;  %v135_v62 = vadd.f32 %v132_v52, %v113_v54 }
  0x91   :  { %v90_v50 = vmul.f32 %v87_v35, %v82_v24 }
  0x92   :  { %v138_v3 = vmax.f32 %v135_v62, 0.0 }
  0x93   :  { %v144_v29 = vpop.permute.xlu0 %143  ;;  %v93_v59 = vadd.f32 %v90_v50, %v71_v53 }
  0x94   :  { %v156_v8 = vmul.f32 %v144_v29, %v138_v3 }
  0x95   :  { %v100_v28 = vpop.permute.xlu1 %99 }
  0x96   :  { %v111_v55 = vmul.f32 %v109_v39, %v100_v28 }
  0x98   :  { %v78_v38 = vpop.permute.xlu0 %77 }
  0x99   :  { %v104_v32 = vpop.permute.xlu1 %103  ;;  %v89_v44 = vmul.f32 %v87_v35, %v78_v38 }
  0x9a   :  { %v112_v56 = vmul.f32 %v109_v39, %v104_v32 }
  0x9b   :  { %v92_v51 = vadd.f32 %v89_v44, %v70_v43 }
  0x9c   :  { %v115_v63 = vadd.f32 %v112_v56, %v93_v59  ;;  %v175_v13 = vpop.permute.xlu0 %174 }
  0x9d   :  { %v114_v60 = vadd.f32 %v111_v55, %v92_v51 }
  0x9e   :  { %v122_v41 = vpop.permute.xlu1 %121 }
  0x9f   :  { %v133_v57 = vmul.f32 %v131_v45, %v122_v41 }
  0xa1   :  { %v136_v0 = vadd.f32 %v133_v57, %v114_v60  ;;  %v195_v23 = vpop.permute.xlu0 %194 }
  0xa2   :  { %v126_v48 = vpop.permute.xlu1 %125  ;;  %v205_v28 = vmul.f32 %v195_v23, %v138_v3 }
  0xa3   :  { %v134_v61 = vmul.f32 %v131_v45, %v126_v48  ;;  %v139_v4 = vmax.f32 %v136_v0, 0.0 }
  0xa5   :  { %v137_v1 = vadd.f32 %v134_v61, %v115_v63  ;;  %v182_v14 = vmul.f32 %v175_v13, %v139_v4 }
  0xa6   :  { %v224_v47 = vpop.permute.xlu0 %223 }
  0xa7   :  { %v149_v58 = vpop.permute.xlu1 %148  ;;  %v140_v5 = vmax.f32 %v137_v1, 0.0 }
  0xa8   :  { %v157_v6 = vmul.f32 %v149_v58, %v139_v4 }
  0xaa   :  { %v159_v10 = vadd.f32 %v157_v6, %v156_v8 }
  0xac   :  { %v171_v2 = vpop.permute.xlu1 %170 }
  0xad   :  { %v181_v11 = vmul.f32 %v171_v2, %v138_v3 }
  0xaf   :  { %v184_v18 = vadd.f32 %v182_v14, %v181_v11 }
  0xb1   :  { %v154_v7 = vpop.permute.xlu1 %153 }
  0xb2   :  { %v158_v9 = vmul.f32 %v154_v7, %v140_v5 }
  0xb4   :  { %v161_v12 = vsel %vm160_vm0, %v158_v9, 0.0 }
  0xb5   :  { %v162_v15 = vadd.f32 %v161_v12, %v159_v10 }
  0xb6   :  { %v179_v16 = vpop.permute.xlu1 %178 }
  0xb7   :  { %v183_v17 = vmul.f32 %v179_v16, %v140_v5  ;;  %v163_v20 = vrot.slane %v162_v15, 4 }
  0xb9   :  { %v185_v19 = vsel %vm160_vm0, %v183_v17, 0.0  ;;  %v164_v26 = vadd.f32 %v163_v20, %v162_v15 }
  0xba   :  { %v186_v21 = vadd.f32 %v185_v19, %v184_v18 }
  0xbb   :  { %v199_v22 = vpop.permute.xlu1 %198  ;;  %v165_v33 = vrot.slane %v164_v26, 2 }
  0xbc   :  { %v187_v24 = vrot.slane %v186_v21, 4  ;;  %v206_v25 = vmul.f32 %v199_v22, %v139_v4 }
  0xbd   :  { %v166_v38 = vadd.f32 %v165_v33, %v164_v26 }
  0xbe   :  { %v188_v27 = vadd.f32 %v187_v24, %v186_v21  ;;  %v208_v32 = vadd.f32 %v206_v25, %v205_v28 }
  0xbf   :  { %v203_v29 = vpop.permute.xlu1 %202  ;;  %v167_v42 = vrot.slane %v166_v38, 1 }
  0xc0   :  { %v189_v30 = vrot.slane %v188_v27, 2  ;;  %v207_v31 = vmul.f32 %v203_v29, %v140_v5 }
  0xc1   :  { %v168_v46 = vadd.f32 %v167_v42, %v166_v38 }
  0xc2   :  { %v209_v34 = vsel %vm160_vm0, %v207_v31, 0.0  ;;  %v190_v36 = vadd.f32 %v189_v30, %v188_v27 }
  0xc3   :  { %v210_v35 = vadd.f32 %v209_v34, %v208_v32 }
  0xc4   :  { %v191_v40 = vrot.slane %v190_v36, 1 }
  0xc5   :  { %v211_v37 = vrot.slane %v210_v35, 4 }
  0xc6   :  { %v192_v44 = vadd.f32 %v191_v40, %v190_v36 }
  0xc7   :  { %v212_v39 = vadd.f32 %v211_v37, %v210_v35 }
  0xc8   :  { %v218_v49 = vsel %vm217_vm1, %v168_v46, %v192_v44 }
  0xc9   :  { %v213_v41 = vrot.slane %v212_v39, 2 }
  0xcb   :  { %v214_v43 = vadd.f32 %v213_v41, %v212_v39 }
  0xcd   :  { %v215_v45 = vrot.slane %v214_v43, 1 }
  0xcf   :  { %v216_v48 = vadd.f32 %v215_v45, %v214_v43 }
  0xd1   :  { %v220_v50 = vsel %vm219_vm2, %v218_v49, %v216_v48 }
  0xd2   :  { %v226_v51 = vadd.f32 %v224_v47, %v220_v50 }
  0xd4   :  { %227 = vst [vmem:[#allocation2] sm:$0x7] %v226_v51 }
  0xd5   :  { %275 = shalt.err (!%p272_p4)
}
  0xd6   :  { %237 = dma.vmem_to_hbm [thread:$0]  %s235_s11, 64, %s365_s5, [#allocation3]  }
  0xd7   :  { %284 = dma.done.wait [#allocation3], 64  }
  0xd8   :  { %285 = vsyncadd [#allocation3], 4294967232 }
  0xd9   :  { %241 = vsyncpa [#allocation3], 1 }

</bundles_post_ra>
